<compile_context>
chip_gen: v5e
topology: v5e:2x2
jax: 0.10.0
libtpu: 0.0.40
codegen_flags: <defaults>
</compile_context>

<pallas_src>
import jax
import jax.numpy as jnp
from jax import lax
from jax.experimental import pallas as pl
from jax.experimental.pallas import tpu as pltpu


def _make_attention_kernel(n_heads, head_dim, n_items, batch):
    eps = 1e-5  # torch.nn.LayerNorm default
    S = n_items

    def kernel(x_ref, wq_ref, wk_ref, wv_ref, wo_ref,
               bq_ref, bk_ref, bv_ref, bo_ref,
               gamma_ref, beta_ref, o_ref):
        x = x_ref[...]                          # (B*S, E) f32 — residual / LN path
        xb = x.astype(jnp.bfloat16)             # MXU operand

        # Q/K/V projections: (B*S, E) @ (E, E), bf16 operands, f32 accumulation.
        # The 1/sqrt(head_dim) scale is already folded into Wq / bq.
        q = jnp.dot(xb, wq_ref[...], preferred_element_type=jnp.float32) + bq_ref[...]
        k = jnp.dot(xb, wk_ref[...], preferred_element_type=jnp.float32) + bk_ref[...]
        v = jnp.dot(xb, wv_ref[...], preferred_element_type=jnp.float32) + bv_ref[...]

        # Attention: static per-batch / per-head loops (B and H are tiny).
        # Head outputs are concatenated back to a lane-dense (B*S, E) slab so
        # the output projection is a single full-K MXU pass.
        batch_rows = []
        for b in range(batch):
            r0 = b * S
            head_outs = []
            for h in range(n_heads):
                c0 = h * head_dim
                qh = q[r0:r0 + S, c0:c0 + head_dim]          # (S, Dh)
                kh = k[r0:r0 + S, c0:c0 + head_dim]
                vh = v[r0:r0 + S, c0:c0 + head_dim]
                # q @ k^T without an explicit transpose of k (contract last dims).
                s = lax.dot_general(qh, kh, (((1,), (1,)), ((), ())),
                                    preferred_element_type=jnp.float32)  # (S, S)
                s = s - jnp.max(s, axis=-1, keepdims=True)
                p = jnp.exp(s)
                denom = jnp.sum(p, axis=-1, keepdims=True)
                p = p * pl.reciprocal(denom, approx=True)    # EUP, not VALU divide
                head_outs.append(jnp.dot(p, vh, preferred_element_type=jnp.float32))
            batch_rows.append(jnp.concatenate(head_outs, axis=-1))      # (S, E)
        attn = jnp.concatenate(batch_rows, axis=0)                      # (B*S, E)

        # Single full-width output projection (bf16 MXU operands, f32 accum).
        out = jnp.dot(attn.astype(jnp.bfloat16), wo_ref[...],
                      preferred_element_type=jnp.float32) + bo_ref[...]

        # LayerNorm with normalized_shape=(n_items, E): statistics over the
        # whole (S, E) slab of each batch element.  Then residual + ReLU.
        gamma = gamma_ref[...]
        beta = beta_ref[...]
        for b in range(batch):
            r0 = b * S
            ob = out[r0:r0 + S, :]                           # (S, E)
            mu = jnp.mean(ob, keepdims=True)                 # (1, 1)
            var = jnp.mean((ob - mu) ** 2, keepdims=True)    # (1, 1)
            y = (ob - mu) * lax.rsqrt(var + eps)
            y = y * gamma + beta
            o_ref[r0:r0 + S, :] = jnp.maximum(y + x[r0:r0 + S, :], 0.0)

    return kernel


def attention_forward(x, wq, wk, wv, wo, bq, bk, bv, bo, gamma, beta, *, n_heads):
    """x: (n_items, batch, embed)  — PyTorch MHA default (seq, batch, embed)."""
    S, B, E = x.shape
    assert E % n_heads == 0
    head_dim = E // n_heads
    scale = 1.0 / (head_dim ** 0.5)

    # (S, B, E) -> (B*S, E): one lane-dense slab; batch folded into matmul M.
    xb = jnp.transpose(x, (1, 0, 2)).reshape(B * S, E).astype(jnp.float32)

    # Weight prep (one-time): fold softmax scale into Wq/bq; cast MXU weight
    # operands to bf16 (halves weight DMA bytes; native MXU input on all gens).
    wq_p = (wq * scale).astype(jnp.bfloat16)
    wk_p = wk.astype(jnp.bfloat16)
    wv_p = wv.astype(jnp.bfloat16)
    wo_p = wo.astype(jnp.bfloat16)
    bq_p = (bq * scale).reshape(1, E).astype(jnp.float32)
    bk_p = bk.reshape(1, E).astype(jnp.float32)
    bv_p = bv.reshape(1, E).astype(jnp.float32)
    bo_p = bo.reshape(1, E).astype(jnp.float32)

    kernel = _make_attention_kernel(n_heads, head_dim, S, B)

    full = lambda i: (0, 0)
    out = pl.pallas_call(
        kernel,
        out_shape=jax.ShapeDtypeStruct((B * S, E), jnp.float32),
        grid=(1,),                               # single step: no per-step overhead
        in_specs=[pl.BlockSpec((B * S, E), full),
                  pl.BlockSpec((E, E), full), pl.BlockSpec((E, E), full),
                  pl.BlockSpec((E, E), full), pl.BlockSpec((E, E), full),
                  pl.BlockSpec((1, E), full), pl.BlockSpec((1, E), full),
                  pl.BlockSpec((1, E), full), pl.BlockSpec((1, E), full),
                  pl.BlockSpec((S, E), full), pl.BlockSpec((S, E), full)],
        out_specs=pl.BlockSpec((B * S, E), full),
        compiler_params=pltpu.CompilerParams(
            dimension_semantics=("arbitrary",)),
    )(xb, wq_p, wk_p, wv_p, wo_p, bq_p, bk_p, bv_p, bo_p,
      gamma.astype(jnp.float32), beta.astype(jnp.float32))

    return jnp.transpose(out.reshape(B, S, E), (1, 0, 2))    # back to (S, B, E)


def _reference(x, wq, wk, wv, wo, bq, bk, bv, bo, gamma, beta, n_heads):
    """Pure-JAX (f32) reimplementation of the PyTorch forward, for the check."""
    S, B, E = x.shape
    Dh = E // n_heads
    q = x @ wq + bq
    k = x @ wk + bk
    v = x @ wv + bv

    def heads(t):  # (S,B,E) -> (B,H,S,Dh)
        return jnp.transpose(t.reshape(S, B, n_heads, Dh), (1, 2, 0, 3))

    qh, kh, vh = heads(q), heads(k), heads(v)
    scores = jnp.einsum("bhsd,bhtd->bhst", qh, kh) / jnp.sqrt(jnp.float32(Dh))
    p = jax.nn.softmax(scores, axis=-1)
    attn = jnp.einsum("bhst,bhtd->bhsd", p, vh)
    attn = jnp.transpose(attn, (2, 0, 1, 3)).reshape(S, B, E)
    o = attn @ wo + bo

    ob = jnp.transpose(o, (1, 0, 2))                       # (B, S, E)
    mu = jnp.mean(ob, axis=(1, 2), keepdims=True)
    var = jnp.mean((ob - mu) ** 2, axis=(1, 2), keepdims=True)
    y = (ob - mu) / jnp.sqrt(var + 1e-5) * gamma + beta
    y = jnp.transpose(y, (1, 0, 2))                        # (S, B, E)
    return jnp.maximum(y + x, 0.0)


if __name__ == "__main__":
    # Module hyper-params: embed = n_units * n_heads = 128 (lane-aligned),
    # n_items (= seq len) = 8 (sublane-aligned), batch = 2.
    n_units, n_heads, n_items = 32, 4, 8
    E = n_units * n_heads
    batch = 2

    key = jax.random.PRNGKey(0)
    keys = jax.random.split(key, 11)

    x = jax.random.normal(keys[0], (n_items, batch, E), dtype=jnp.float32)

    # Parameters stored as (in, out) for x @ W + b (i.e. transposed torch layout).
    wq = jax.random.normal(keys[1], (E, E), dtype=jnp.float32) * 0.05
    wk = jax.random.normal(keys[2], (E, E), dtype=jnp.float32) * 0.05
    wv = jax.random.normal(keys[3], (E, E), dtype=jnp.float32) * 0.05
    wo = jax.random.normal(keys[4], (E, E), dtype=jnp.float32) * 0.05
    bq = jax.random.normal(keys[5], (E,), dtype=jnp.float32) * 0.01
    bk = jax.random.normal(keys[6], (E,), dtype=jnp.float32) * 0.01
    bv = jax.random.normal(keys[7], (E,), dtype=jnp.float32) * 0.01
    bo = jax.random.normal(keys[8], (E,), dtype=jnp.float32) * 0.01
    gamma = 1.0 + 0.1 * jax.random.normal(keys[9], (n_items, E), dtype=jnp.float32)
    beta = 0.1 * jax.random.normal(keys[10], (n_items, E), dtype=jnp.float32)

    out = attention_forward(x, wq, wk, wv, wo, bq, bk, bv, bo, gamma, beta,
                            n_heads=n_heads)
    out = jax.block_until_ready(out)

    ref = _reference(x, wq, wk, wv, wo, bq, bk, bv, bo, gamma, beta, n_heads)

    assert out.shape == (n_items, batch, E)
    # bf16 MXU operands => tolerance relaxed from 1e-3 to 2e-2 (per review).
    assert jnp.allclose(out, ref, atol=2e-2, rtol=2e-2)

    print("KERNEL_OK")
</pallas_src>

<mosaic_0001>
module attributes {stable_mosaic.version = 11 : i64} {
  func.func @kernel(%arg0: i32, %arg1: memref<16x128xf32, #tpu.memory_space<vmem>>, %arg2: memref<128x128xbf16, #tpu.memory_space<vmem>>, %arg3: memref<128x128xbf16, #tpu.memory_space<vmem>>, %arg4: memref<128x128xbf16, #tpu.memory_space<vmem>>, %arg5: memref<128x128xbf16, #tpu.memory_space<vmem>>, %arg6: memref<1x128xf32, #tpu.memory_space<vmem>>, %arg7: memref<1x128xf32, #tpu.memory_space<vmem>>, %arg8: memref<1x128xf32, #tpu.memory_space<vmem>>, %arg9: memref<1x128xf32, #tpu.memory_space<vmem>>, %arg10: memref<8x128xf32, #tpu.memory_space<vmem>>, %arg11: memref<8x128xf32, #tpu.memory_space<vmem>>, %arg12: memref<16x128xf32, #tpu.memory_space<vmem>>) attributes {dimension_semantics = [#tpu.dimension_semantics<arbitrary>], iteration_bounds = array<i64: 1>, scalar_prefetch = 0 : i64, scratch_operands = 0 : i64, tpu.core_type = #tpu.core_type<tc>, window_params = [{pipeline_mode = #tpu.pipeline_mode<synchronous>, transform_indices = @transform_0, window_bounds = array<i64: 16, 128>}, {pipeline_mode = #tpu.pipeline_mode<synchronous>, transform_indices = @transform_1, window_bounds = array<i64: 128, 128>}, {pipeline_mode = #tpu.pipeline_mode<synchronous>, transform_indices = @transform_2, window_bounds = array<i64: 128, 128>}, {pipeline_mode = #tpu.pipeline_mode<synchronous>, transform_indices = @transform_3, window_bounds = array<i64: 128, 128>}, {pipeline_mode = #tpu.pipeline_mode<synchronous>, transform_indices = @transform_4, window_bounds = array<i64: 128, 128>}, {pipeline_mode = #tpu.pipeline_mode<synchronous>, transform_indices = @transform_5, window_bounds = array<i64: 1, 128>}, {pipeline_mode = #tpu.pipeline_mode<synchronous>, transform_indices = @transform_6, window_bounds = array<i64: 1, 128>}, {pipeline_mode = #tpu.pipeline_mode<synchronous>, transform_indices = @transform_7, window_bounds = array<i64: 1, 128>}, {pipeline_mode = #tpu.pipeline_mode<synchronous>, transform_indices = @transform_8, window_bounds = array<i64: 1, 128>}, {pipeline_mode = #tpu.pipeline_mode<synchronous>, transform_indices = @transform_9, window_bounds = array<i64: 8, 128>}, {pipeline_mode = #tpu.pipeline_mode<synchronous>, transform_indices = @transform_10, window_bounds = array<i64: 8, 128>}, {pipeline_mode = #tpu.pipeline_mode<synchronous>, transform_indices = @transform_11, window_bounds = array<i64: 16, 128>}]} {
    %c0 = arith.constant 0 : index
    %c0_0 = arith.constant 0 : index
    %0 = vector.load %arg1[%c0, %c0_0] : memref<16x128xf32, #tpu.memory_space<vmem>>, vector<16x128xf32>
    %1 = arith.truncf %0 : vector<16x128xf32> to vector<16x128xbf16>
    %c0_1 = arith.constant 0 : index
    %c0_2 = arith.constant 0 : index
    %2 = vector.load %arg2[%c0_1, %c0_2] : memref<128x128xbf16, #tpu.memory_space<vmem>>, vector<128x128xbf16>
    %cst = arith.constant dense<0.000000e+00> : vector<16x128xf32>
    %3 = tpu.matmul %1, %2, %cst {dimension_numbers = #tpu.dot_dimension_numbers<[1], [0], [0], [1], [0, 0, 1, 1], [], []>} : vector<16x128xbf16>, vector<128x128xbf16>, vector<16x128xf32> -> vector<16x128xf32>
    %c0_3 = arith.constant 0 : index
    %c0_4 = arith.constant 0 : index
    %4 = vector.load %arg6[%c0_3, %c0_4] : memref<1x128xf32, #tpu.memory_space<vmem>>, vector<1x128xf32>
    %5 = vector.broadcast %4 : vector<1x128xf32> to vector<16x128xf32>
    %6 = arith.addf %3, %5 : vector<16x128xf32>
    %c0_5 = arith.constant 0 : index
    %c0_6 = arith.constant 0 : index
    %7 = vector.load %arg3[%c0_5, %c0_6] : memref<128x128xbf16, #tpu.memory_space<vmem>>, vector<128x128xbf16>
    %cst_7 = arith.constant dense<0.000000e+00> : vector<16x128xf32>
    %8 = tpu.matmul %1, %7, %cst_7 {dimension_numbers = #tpu.dot_dimension_numbers<[1], [0], [0], [1], [0, 0, 1, 1], [], []>} : vector<16x128xbf16>, vector<128x128xbf16>, vector<16x128xf32> -> vector<16x128xf32>
    %c0_8 = arith.constant 0 : index
    %c0_9 = arith.constant 0 : index
    %9 = vector.load %arg7[%c0_8, %c0_9] : memref<1x128xf32, #tpu.memory_space<vmem>>, vector<1x128xf32>
    %10 = vector.broadcast %9 : vector<1x128xf32> to vector<16x128xf32>
    %11 = arith.addf %8, %10 : vector<16x128xf32>
    %c0_10 = arith.constant 0 : index
    %c0_11 = arith.constant 0 : index
    %12 = vector.load %arg4[%c0_10, %c0_11] : memref<128x128xbf16, #tpu.memory_space<vmem>>, vector<128x128xbf16>
    %cst_12 = arith.constant dense<0.000000e+00> : vector<16x128xf32>
    %13 = tpu.matmul %1, %12, %cst_12 {dimension_numbers = #tpu.dot_dimension_numbers<[1], [0], [0], [1], [0, 0, 1, 1], [], []>} : vector<16x128xbf16>, vector<128x128xbf16>, vector<16x128xf32> -> vector<16x128xf32>
    %c0_13 = arith.constant 0 : index
    %c0_14 = arith.constant 0 : index
    %14 = vector.load %arg8[%c0_13, %c0_14] : memref<1x128xf32, #tpu.memory_space<vmem>>, vector<1x128xf32>
    %15 = vector.broadcast %14 : vector<1x128xf32> to vector<16x128xf32>
    %16 = arith.addf %13, %15 : vector<16x128xf32>
    %17 = vector.extract_strided_slice %6 {offsets = [0, 0], sizes = [8, 32], strides = [1, 1]} : vector<16x128xf32> to vector<8x32xf32>
    %18 = vector.extract_strided_slice %11 {offsets = [0, 0], sizes = [8, 32], strides = [1, 1]} : vector<16x128xf32> to vector<8x32xf32>
    %19 = vector.extract_strided_slice %16 {offsets = [0, 0], sizes = [8, 32], strides = [1, 1]} : vector<16x128xf32> to vector<8x32xf32>
    %cst_15 = arith.constant dense<0.000000e+00> : vector<8x8xf32>
    %20 = tpu.matmul %17, %18, %cst_15 {dimension_numbers = #tpu.dot_dimension_numbers<[1], [1], [0], [0], [0, 0, 1, 0], [], []>} : vector<8x32xf32>, vector<8x32xf32>, vector<8x8xf32> -> vector<8x8xf32>
    %cst_16 = arith.constant dense<0xFF800000> : vector<8xf32>
    %21 = vector.multi_reduction <maximumf>, %20, %cst_16 [1] : vector<8x8xf32> to vector<8xf32>
    %22 = vector.shape_cast %21 : vector<8xf32> to vector<8x1xf32>
    %23 = vector.broadcast %22 : vector<8x1xf32> to vector<8x8xf32>
    %24 = arith.subf %20, %23 : vector<8x8xf32>
    %25 = math.exp %24 : vector<8x8xf32>
    %cst_17 = arith.constant dense<0.000000e+00> : vector<8xf32>
    %26 = vector.multi_reduction <add>, %25, %cst_17 [1] : vector<8x8xf32> to vector<8xf32>
    %27 = vector.shape_cast %26 : vector<8xf32> to vector<8x1xf32>
    %28 = tpu.reciprocal %27 {approx = true} : vector<8x1xf32> -> vector<8x1xf32>
    %29 = vector.broadcast %28 : vector<8x1xf32> to vector<8x8xf32>
    %30 = arith.mulf %25, %29 : vector<8x8xf32>
    %cst_18 = arith.constant dense<0.000000e+00> : vector<8x32xf32>
    %31 = tpu.matmul %30, %19, %cst_18 {dimension_numbers = #tpu.dot_dimension_numbers<[1], [0], [0], [1], [0, 0, 1, 1], [], []>} : vector<8x8xf32>, vector<8x32xf32>, vector<8x32xf32> -> vector<8x32xf32>
    %32 = vector.extract_strided_slice %6 {offsets = [0, 32], sizes = [8, 32], strides = [1, 1]} : vector<16x128xf32> to vector<8x32xf32>
    %33 = vector.extract_strided_slice %11 {offsets = [0, 32], sizes = [8, 32], strides = [1, 1]} : vector<16x128xf32> to vector<8x32xf32>
    %34 = vector.extract_strided_slice %16 {offsets = [0, 32], sizes = [8, 32], strides = [1, 1]} : vector<16x128xf32> to vector<8x32xf32>
    %cst_19 = arith.constant dense<0.000000e+00> : vector<8x8xf32>
    %35 = tpu.matmul %32, %33, %cst_19 {dimension_numbers = #tpu.dot_dimension_numbers<[1], [1], [0], [0], [0, 0, 1, 0], [], []>} : vector<8x32xf32>, vector<8x32xf32>, vector<8x8xf32> -> vector<8x8xf32>
    %cst_20 = arith.constant dense<0xFF800000> : vector<8xf32>
    %36 = vector.multi_reduction <maximumf>, %35, %cst_20 [1] : vector<8x8xf32> to vector<8xf32>
    %37 = vector.shape_cast %36 : vector<8xf32> to vector<8x1xf32>
    %38 = vector.broadcast %37 : vector<8x1xf32> to vector<8x8xf32>
    %39 = arith.subf %35, %38 : vector<8x8xf32>
    %40 = math.exp %39 : vector<8x8xf32>
    %cst_21 = arith.constant dense<0.000000e+00> : vector<8xf32>
    %41 = vector.multi_reduction <add>, %40, %cst_21 [1] : vector<8x8xf32> to vector<8xf32>
    %42 = vector.shape_cast %41 : vector<8xf32> to vector<8x1xf32>
    %43 = tpu.reciprocal %42 {approx = true} : vector<8x1xf32> -> vector<8x1xf32>
    %44 = vector.broadcast %43 : vector<8x1xf32> to vector<8x8xf32>
    %45 = arith.mulf %40, %44 : vector<8x8xf32>
    %cst_22 = arith.constant dense<0.000000e+00> : vector<8x32xf32>
    %46 = tpu.matmul %45, %34, %cst_22 {dimension_numbers = #tpu.dot_dimension_numbers<[1], [0], [0], [1], [0, 0, 1, 1], [], []>} : vector<8x8xf32>, vector<8x32xf32>, vector<8x32xf32> -> vector<8x32xf32>
    %47 = vector.extract_strided_slice %6 {offsets = [0, 64], sizes = [8, 32], strides = [1, 1]} : vector<16x128xf32> to vector<8x32xf32>
    %48 = vector.extract_strided_slice %11 {offsets = [0, 64], sizes = [8, 32], strides = [1, 1]} : vector<16x128xf32> to vector<8x32xf32>
    %49 = vector.extract_strided_slice %16 {offsets = [0, 64], sizes = [8, 32], strides = [1, 1]} : vector<16x128xf32> to vector<8x32xf32>
    %cst_23 = arith.constant dense<0.000000e+00> : vector<8x8xf32>
    %50 = tpu.matmul %47, %48, %cst_23 {dimension_numbers = #tpu.dot_dimension_numbers<[1], [1], [0], [0], [0, 0, 1, 0], [], []>} : vector<8x32xf32>, vector<8x32xf32>, vector<8x8xf32> -> vector<8x8xf32>
    %cst_24 = arith.constant dense<0xFF800000> : vector<8xf32>
    %51 = vector.multi_reduction <maximumf>, %50, %cst_24 [1] : vector<8x8xf32> to vector<8xf32>
    %52 = vector.shape_cast %51 : vector<8xf32> to vector<8x1xf32>
    %53 = vector.broadcast %52 : vector<8x1xf32> to vector<8x8xf32>
    %54 = arith.subf %50, %53 : vector<8x8xf32>
    %55 = math.exp %54 : vector<8x8xf32>
    %cst_25 = arith.constant dense<0.000000e+00> : vector<8xf32>
    %56 = vector.multi_reduction <add>, %55, %cst_25 [1] : vector<8x8xf32> to vector<8xf32>
    %57 = vector.shape_cast %56 : vector<8xf32> to vector<8x1xf32>
    %58 = tpu.reciprocal %57 {approx = true} : vector<8x1xf32> -> vector<8x1xf32>
    %59 = vector.broadcast %58 : vector<8x1xf32> to vector<8x8xf32>
    %60 = arith.mulf %55, %59 : vector<8x8xf32>
    %cst_26 = arith.constant dense<0.000000e+00> : vector<8x32xf32>
    %61 = tpu.matmul %60, %49, %cst_26 {dimension_numbers = #tpu.dot_dimension_numbers<[1], [0], [0], [1], [0, 0, 1, 1], [], []>} : vector<8x8xf32>, vector<8x32xf32>, vector<8x32xf32> -> vector<8x32xf32>
    %62 = vector.extract_strided_slice %6 {offsets = [0, 96], sizes = [8, 32], strides = [1, 1]} : vector<16x128xf32> to vector<8x32xf32>
    %63 = vector.extract_strided_slice %11 {offsets = [0, 96], sizes = [8, 32], strides = [1, 1]} : vector<16x128xf32> to vector<8x32xf32>
    %64 = vector.extract_strided_slice %16 {offsets = [0, 96], sizes = [8, 32], strides = [1, 1]} : vector<16x128xf32> to vector<8x32xf32>
    %cst_27 = arith.constant dense<0.000000e+00> : vector<8x8xf32>
    %65 = tpu.matmul %62, %63, %cst_27 {dimension_numbers = #tpu.dot_dimension_numbers<[1], [1], [0], [0], [0, 0, 1, 0], [], []>} : vector<8x32xf32>, vector<8x32xf32>, vector<8x8xf32> -> vector<8x8xf32>
    %cst_28 = arith.constant dense<0xFF800000> : vector<8xf32>
    %66 = vector.multi_reduction <maximumf>, %65, %cst_28 [1] : vector<8x8xf32> to vector<8xf32>
    %67 = vector.shape_cast %66 : vector<8xf32> to vector<8x1xf32>
    %68 = vector.broadcast %67 : vector<8x1xf32> to vector<8x8xf32>
    %69 = arith.subf %65, %68 : vector<8x8xf32>
    %70 = math.exp %69 : vector<8x8xf32>
    %cst_29 = arith.constant dense<0.000000e+00> : vector<8xf32>
    %71 = vector.multi_reduction <add>, %70, %cst_29 [1] : vector<8x8xf32> to vector<8xf32>
    %72 = vector.shape_cast %71 : vector<8xf32> to vector<8x1xf32>
    %73 = tpu.reciprocal %72 {approx = true} : vector<8x1xf32> -> vector<8x1xf32>
    %74 = vector.broadcast %73 : vector<8x1xf32> to vector<8x8xf32>
    %75 = arith.mulf %70, %74 : vector<8x8xf32>
    %cst_30 = arith.constant dense<0.000000e+00> : vector<8x32xf32>
    %76 = tpu.matmul %75, %64, %cst_30 {dimension_numbers = #tpu.dot_dimension_numbers<[1], [0], [0], [1], [0, 0, 1, 1], [], []>} : vector<8x8xf32>, vector<8x32xf32>, vector<8x32xf32> -> vector<8x32xf32>
    %77 = tpu.concatenate %31, %46, %61, %76 in 1 : vector<8x32xf32>, vector<8x32xf32>, vector<8x32xf32>, vector<8x32xf32> -> vector<8x128xf32>
    %78 = vector.extract_strided_slice %6 {offsets = [8, 0], sizes = [8, 32], strides = [1, 1]} : vector<16x128xf32> to vector<8x32xf32>
    %79 = vector.extract_strided_slice %11 {offsets = [8, 0], sizes = [8, 32], strides = [1, 1]} : vector<16x128xf32> to vector<8x32xf32>
    %80 = vector.extract_strided_slice %16 {offsets = [8, 0], sizes = [8, 32], strides = [1, 1]} : vector<16x128xf32> to vector<8x32xf32>
    %cst_31 = arith.constant dense<0.000000e+00> : vector<8x8xf32>
    %81 = tpu.matmul %78, %79, %cst_31 {dimension_numbers = #tpu.dot_dimension_numbers<[1], [1], [0], [0], [0, 0, 1, 0], [], []>} : vector<8x32xf32>, vector<8x32xf32>, vector<8x8xf32> -> vector<8x8xf32>
    %cst_32 = arith.constant dense<0xFF800000> : vector<8xf32>
    %82 = vector.multi_reduction <maximumf>, %81, %cst_32 [1] : vector<8x8xf32> to vector<8xf32>
    %83 = vector.shape_cast %82 : vector<8xf32> to vector<8x1xf32>
    %84 = vector.broadcast %83 : vector<8x1xf32> to vector<8x8xf32>
    %85 = arith.subf %81, %84 : vector<8x8xf32>
    %86 = math.exp %85 : vector<8x8xf32>
    %cst_33 = arith.constant dense<0.000000e+00> : vector<8xf32>
    %87 = vector.multi_reduction <add>, %86, %cst_33 [1] : vector<8x8xf32> to vector<8xf32>
    %88 = vector.shape_cast %87 : vector<8xf32> to vector<8x1xf32>
    %89 = tpu.reciprocal %88 {approx = true} : vector<8x1xf32> -> vector<8x1xf32>
    %90 = vector.broadcast %89 : vector<8x1xf32> to vector<8x8xf32>
    %91 = arith.mulf %86, %90 : vector<8x8xf32>
    %cst_34 = arith.constant dense<0.000000e+00> : vector<8x32xf32>
    %92 = tpu.matmul %91, %80, %cst_34 {dimension_numbers = #tpu.dot_dimension_numbers<[1], [0], [0], [1], [0, 0, 1, 1], [], []>} : vector<8x8xf32>, vector<8x32xf32>, vector<8x32xf32> -> vector<8x32xf32>
    %93 = vector.extract_strided_slice %6 {offsets = [8, 32], sizes = [8, 32], strides = [1, 1]} : vector<16x128xf32> to vector<8x32xf32>
    %94 = vector.extract_strided_slice %11 {offsets = [8, 32], sizes = [8, 32], strides = [1, 1]} : vector<16x128xf32> to vector<8x32xf32>
    %95 = vector.extract_strided_slice %16 {offsets = [8, 32], sizes = [8, 32], strides = [1, 1]} : vector<16x128xf32> to vector<8x32xf32>
    %cst_35 = arith.constant dense<0.000000e+00> : vector<8x8xf32>
    %96 = tpu.matmul %93, %94, %cst_35 {dimension_numbers = #tpu.dot_dimension_numbers<[1], [1], [0], [0], [0, 0, 1, 0], [], []>} : vector<8x32xf32>, vector<8x32xf32>, vector<8x8xf32> -> vector<8x8xf32>
    %cst_36 = arith.constant dense<0xFF800000> : vector<8xf32>
    %97 = vector.multi_reduction <maximumf>, %96, %cst_36 [1] : vector<8x8xf32> to vector<8xf32>
    %98 = vector.shape_cast %97 : vector<8xf32> to vector<8x1xf32>
    %99 = vector.broadcast %98 : vector<8x1xf32> to vector<8x8xf32>
    %100 = arith.subf %96, %99 : vector<8x8xf32>
    %101 = math.exp %100 : vector<8x8xf32>
    %cst_37 = arith.constant dense<0.000000e+00> : vector<8xf32>
    %102 = vector.multi_reduction <add>, %101, %cst_37 [1] : vector<8x8xf32> to vector<8xf32>
    %103 = vector.shape_cast %102 : vector<8xf32> to vector<8x1xf32>
    %104 = tpu.reciprocal %103 {approx = true} : vector<8x1xf32> -> vector<8x1xf32>
    %105 = vector.broadcast %104 : vector<8x1xf32> to vector<8x8xf32>
    %106 = arith.mulf %101, %105 : vector<8x8xf32>
    %cst_38 = arith.constant dense<0.000000e+00> : vector<8x32xf32>
    %107 = tpu.matmul %106, %95, %cst_38 {dimension_numbers = #tpu.dot_dimension_numbers<[1], [0], [0], [1], [0, 0, 1, 1], [], []>} : vector<8x8xf32>, vector<8x32xf32>, vector<8x32xf32> -> vector<8x32xf32>
    %108 = vector.extract_strided_slice %6 {offsets = [8, 64], sizes = [8, 32], strides = [1, 1]} : vector<16x128xf32> to vector<8x32xf32>
    %109 = vector.extract_strided_slice %11 {offsets = [8, 64], sizes = [8, 32], strides = [1, 1]} : vector<16x128xf32> to vector<8x32xf32>
    %110 = vector.extract_strided_slice %16 {offsets = [8, 64], sizes = [8, 32], strides = [1, 1]} : vector<16x128xf32> to vector<8x32xf32>
    %cst_39 = arith.constant dense<0.000000e+00> : vector<8x8xf32>
    %111 = tpu.matmul %108, %109, %cst_39 {dimension_numbers = #tpu.dot_dimension_numbers<[1], [1], [0], [0], [0, 0, 1, 0], [], []>} : vector<8x32xf32>, vector<8x32xf32>, vector<8x8xf32> -> vector<8x8xf32>
    %cst_40 = arith.constant dense<0xFF800000> : vector<8xf32>
    %112 = vector.multi_reduction <maximumf>, %111, %cst_40 [1] : vector<8x8xf32> to vector<8xf32>
    %113 = vector.shape_cast %112 : vector<8xf32> to vector<8x1xf32>
    %114 = vector.broadcast %113 : vector<8x1xf32> to vector<8x8xf32>
    %115 = arith.subf %111, %114 : vector<8x8xf32>
    %116 = math.exp %115 : vector<8x8xf32>
    %cst_41 = arith.constant dense<0.000000e+00> : vector<8xf32>
    %117 = vector.multi_reduction <add>, %116, %cst_41 [1] : vector<8x8xf32> to vector<8xf32>
    %118 = vector.shape_cast %117 : vector<8xf32> to vector<8x1xf32>
    %119 = tpu.reciprocal %118 {approx = true} : vector<8x1xf32> -> vector<8x1xf32>
    %120 = vector.broadcast %119 : vector<8x1xf32> to vector<8x8xf32>
    %121 = arith.mulf %116, %120 : vector<8x8xf32>
    %cst_42 = arith.constant dense<0.000000e+00> : vector<8x32xf32>
    %122 = tpu.matmul %121, %110, %cst_42 {dimension_numbers = #tpu.dot_dimension_numbers<[1], [0], [0], [1], [0, 0, 1, 1], [], []>} : vector<8x8xf32>, vector<8x32xf32>, vector<8x32xf32> -> vector<8x32xf32>
    %123 = vector.extract_strided_slice %6 {offsets = [8, 96], sizes = [8, 32], strides = [1, 1]} : vector<16x128xf32> to vector<8x32xf32>
    %124 = vector.extract_strided_slice %11 {offsets = [8, 96], sizes = [8, 32], strides = [1, 1]} : vector<16x128xf32> to vector<8x32xf32>
    %125 = vector.extract_strided_slice %16 {offsets = [8, 96], sizes = [8, 32], strides = [1, 1]} : vector<16x128xf32> to vector<8x32xf32>
    %cst_43 = arith.constant dense<0.000000e+00> : vector<8x8xf32>
    %126 = tpu.matmul %123, %124, %cst_43 {dimension_numbers = #tpu.dot_dimension_numbers<[1], [1], [0], [0], [0, 0, 1, 0], [], []>} : vector<8x32xf32>, vector<8x32xf32>, vector<8x8xf32> -> vector<8x8xf32>
    %cst_44 = arith.constant dense<0xFF800000> : vector<8xf32>
    %127 = vector.multi_reduction <maximumf>, %126, %cst_44 [1] : vector<8x8xf32> to vector<8xf32>
    %128 = vector.shape_cast %127 : vector<8xf32> to vector<8x1xf32>
    %129 = vector.broadcast %128 : vector<8x1xf32> to vector<8x8xf32>
    %130 = arith.subf %126, %129 : vector<8x8xf32>
    %131 = math.exp %130 : vector<8x8xf32>
    %cst_45 = arith.constant dense<0.000000e+00> : vector<8xf32>
    %132 = vector.multi_reduction <add>, %131, %cst_45 [1] : vector<8x8xf32> to vector<8xf32>
    %133 = vector.shape_cast %132 : vector<8xf32> to vector<8x1xf32>
    %134 = tpu.reciprocal %133 {approx = true} : vector<8x1xf32> -> vector<8x1xf32>
    %135 = vector.broadcast %134 : vector<8x1xf32> to vector<8x8xf32>
    %136 = arith.mulf %131, %135 : vector<8x8xf32>
    %cst_46 = arith.constant dense<0.000000e+00> : vector<8x32xf32>
    %137 = tpu.matmul %136, %125, %cst_46 {dimension_numbers = #tpu.dot_dimension_numbers<[1], [0], [0], [1], [0, 0, 1, 1], [], []>} : vector<8x8xf32>, vector<8x32xf32>, vector<8x32xf32> -> vector<8x32xf32>
    %138 = tpu.concatenate %92, %107, %122, %137 in 1 : vector<8x32xf32>, vector<8x32xf32>, vector<8x32xf32>, vector<8x32xf32> -> vector<8x128xf32>
    %139 = tpu.concatenate %77, %138 in 0 : vector<8x128xf32>, vector<8x128xf32> -> vector<16x128xf32>
    %140 = arith.truncf %139 : vector<16x128xf32> to vector<16x128xbf16>
    %c0_47 = arith.constant 0 : index
    %c0_48 = arith.constant 0 : index
    %141 = vector.load %arg5[%c0_47, %c0_48] : memref<128x128xbf16, #tpu.memory_space<vmem>>, vector<128x128xbf16>
    %cst_49 = arith.constant dense<0.000000e+00> : vector<16x128xf32>
    %142 = tpu.matmul %140, %141, %cst_49 {dimension_numbers = #tpu.dot_dimension_numbers<[1], [0], [0], [1], [0, 0, 1, 1], [], []>} : vector<16x128xbf16>, vector<128x128xbf16>, vector<16x128xf32> -> vector<16x128xf32>
    %c0_50 = arith.constant 0 : index
    %c0_51 = arith.constant 0 : index
    %143 = vector.load %arg9[%c0_50, %c0_51] : memref<1x128xf32, #tpu.memory_space<vmem>>, vector<1x128xf32>
    %144 = vector.broadcast %143 : vector<1x128xf32> to vector<16x128xf32>
    %145 = arith.addf %142, %144 : vector<16x128xf32>
    %c0_52 = arith.constant 0 : index
    %c0_53 = arith.constant 0 : index
    %146 = vector.load %arg10[%c0_52, %c0_53] : memref<8x128xf32, #tpu.memory_space<vmem>>, vector<8x128xf32>
    %c0_54 = arith.constant 0 : index
    %c0_55 = arith.constant 0 : index
    %147 = vector.load %arg11[%c0_54, %c0_55] : memref<8x128xf32, #tpu.memory_space<vmem>>, vector<8x128xf32>
    %148 = vector.extract_strided_slice %145 {offsets = [0, 0], sizes = [8, 128], strides = [1, 1]} : vector<16x128xf32> to vector<8x128xf32>
    %149 = vector.shape_cast %148 : vector<8x128xf32> to vector<1x8x128xf32>
    %cst_56 = arith.constant dense<0.000000e+00> : vector<1xf32>
    %150 = vector.multi_reduction <add>, %149, %cst_56 [1, 2] : vector<1x8x128xf32> to vector<1xf32>
    %151 = vector.shape_cast %150 : vector<1xf32> to vector<1x1x1xf32>
    %152 = vector.extract %151[0, 0, 0] : f32 from vector<1x1x1xf32>
    %153 = vector.broadcast %152 : f32 to vector<1x1xf32>
    %cst_57 = arith.constant 1.024000e+03 : f32
    %154 = vector.broadcast %cst_57 : f32 to vector<1x1xf32>
    %155 = arith.divf %153, %154 : vector<1x1xf32>
    %156 = vector.broadcast %155 : vector<1x1xf32> to vector<8x128xf32>
    %157 = arith.subf %148, %156 : vector<8x128xf32>
    %158 = arith.mulf %157, %157 : vector<8x128xf32>
    %159 = vector.shape_cast %158 : vector<8x128xf32> to vector<1x8x128xf32>
    %cst_58 = arith.constant dense<0.000000e+00> : vector<1xf32>
    %160 = vector.multi_reduction <add>, %159, %cst_58 [1, 2] : vector<1x8x128xf32> to vector<1xf32>
    %161 = vector.shape_cast %160 : vector<1xf32> to vector<1x1x1xf32>
    %162 = vector.extract %161[0, 0, 0] : f32 from vector<1x1x1xf32>
    %163 = vector.broadcast %162 : f32 to vector<1x1xf32>
    %cst_59 = arith.constant 1.024000e+03 : f32
    %164 = vector.broadcast %cst_59 : f32 to vector<1x1xf32>
    %165 = arith.divf %163, %164 : vector<1x1xf32>
    %166 = vector.broadcast %155 : vector<1x1xf32> to vector<8x128xf32>
    %167 = arith.subf %148, %166 : vector<8x128xf32>
    %cst_60 = arith.constant 9.99999974E-6 : f32
    %168 = vector.broadcast %cst_60 : f32 to vector<1x1xf32>
    %169 = arith.addf %165, %168 : vector<1x1xf32>
    %170 = math.rsqrt %169 : vector<1x1xf32>
    %171 = vector.broadcast %170 : vector<1x1xf32> to vector<8x128xf32>
    %172 = arith.mulf %167, %171 : vector<8x128xf32>
    %173 = arith.mulf %172, %146 : vector<8x128xf32>
    %174 = arith.addf %173, %147 : vector<8x128xf32>
    %175 = vector.extract_strided_slice %0 {offsets = [0, 0], sizes = [8, 128], strides = [1, 1]} : vector<16x128xf32> to vector<8x128xf32>
    %176 = arith.addf %174, %175 : vector<8x128xf32>
    %cst_61 = arith.constant 0.000000e+00 : f32
    %177 = vector.broadcast %cst_61 : f32 to vector<8x128xf32>
    %178 = arith.maximumf %176, %177 : vector<8x128xf32>
    %c0_62 = arith.constant 0 : index
    %c0_63 = arith.constant 0 : index
    %179 = vector.load %arg12[%c0_62, %c0_63] : memref<16x128xf32, #tpu.memory_space<vmem>>, vector<8x128xf32>
    tpu.vector_store %arg12[%c0_62, %c0_63], %178 {strides = array<i32>} : memref<16x128xf32, #tpu.memory_space<vmem>>, vector<8x128xf32>,
    %180 = vector.extract_strided_slice %145 {offsets = [8, 0], sizes = [8, 128], strides = [1, 1]} : vector<16x128xf32> to vector<8x128xf32>
    %181 = vector.shape_cast %180 : vector<8x128xf32> to vector<1x8x128xf32>
    %cst_64 = arith.constant dense<0.000000e+00> : vector<1xf32>
    %182 = vector.multi_reduction <add>, %181, %cst_64 [1, 2] : vector<1x8x128xf32> to vector<1xf32>
    %183 = vector.shape_cast %182 : vector<1xf32> to vector<1x1x1xf32>
    %184 = vector.extract %183[0, 0, 0] : f32 from vector<1x1x1xf32>
    %185 = vector.broadcast %184 : f32 to vector<1x1xf32>
    %cst_65 = arith.constant 1.024000e+03 : f32
    %186 = vector.broadcast %cst_65 : f32 to vector<1x1xf32>
    %187 = arith.divf %185, %186 : vector<1x1xf32>
    %188 = vector.broadcast %187 : vector<1x1xf32> to vector<8x128xf32>
    %189 = arith.subf %180, %188 : vector<8x128xf32>
    %190 = arith.mulf %189, %189 : vector<8x128xf32>
    %191 = vector.shape_cast %190 : vector<8x128xf32> to vector<1x8x128xf32>
    %cst_66 = arith.constant dense<0.000000e+00> : vector<1xf32>
    %192 = vector.multi_reduction <add>, %191, %cst_66 [1, 2] : vector<1x8x128xf32> to vector<1xf32>
    %193 = vector.shape_cast %192 : vector<1xf32> to vector<1x1x1xf32>
    %194 = vector.extract %193[0, 0, 0] : f32 from vector<1x1x1xf32>
    %195 = vector.broadcast %194 : f32 to vector<1x1xf32>
    %cst_67 = arith.constant 1.024000e+03 : f32
    %196 = vector.broadcast %cst_67 : f32 to vector<1x1xf32>
    %197 = arith.divf %195, %196 : vector<1x1xf32>
    %198 = vector.broadcast %187 : vector<1x1xf32> to vector<8x128xf32>
    %199 = arith.subf %180, %198 : vector<8x128xf32>
    %cst_68 = arith.constant 9.99999974E-6 : f32
    %200 = vector.broadcast %cst_68 : f32 to vector<1x1xf32>
    %201 = arith.addf %197, %200 : vector<1x1xf32>
    %202 = math.rsqrt %201 : vector<1x1xf32>
    %203 = vector.broadcast %202 : vector<1x1xf32> to vector<8x128xf32>
    %204 = arith.mulf %199, %203 : vector<8x128xf32>
    %205 = arith.mulf %204, %146 : vector<8x128xf32>
    %206 = arith.addf %205, %147 : vector<8x128xf32>
    %207 = vector.extract_strided_slice %0 {offsets = [8, 0], sizes = [8, 128], strides = [1, 1]} : vector<16x128xf32> to vector<8x128xf32>
    %208 = arith.addf %206, %207 : vector<8x128xf32>
    %cst_69 = arith.constant 0.000000e+00 : f32
    %209 = vector.broadcast %cst_69 : f32 to vector<8x128xf32>
    %210 = arith.maximumf %208, %209 : vector<8x128xf32>
    %c8 = arith.constant 8 : index
    %c0_70 = arith.constant 0 : index
    %211 = vector.load %arg12[%c8, %c0_70] : memref<16x128xf32, #tpu.memory_space<vmem>>, vector<8x128xf32>
    tpu.vector_store %arg12[%c8, %c0_70], %210 {strides = array<i32>} : memref<16x128xf32, #tpu.memory_space<vmem>>, vector<8x128xf32>,
    return
  }
  func.func @transform_0(%arg0: i32) -> (i32, i32) {
    %c0_i32 = arith.constant 0 : i32
    %c0_i32_0 = arith.constant 0 : i32
    %c0_i32_1 = arith.constant 0 : i32
    return %c0_i32, %c0_i32_0 : i32, i32
  }
  func.func @transform_1(%arg0: i32) -> (i32, i32) {
    %c0_i32 = arith.constant 0 : i32
    %c0_i32_0 = arith.constant 0 : i32
    %c0_i32_1 = arith.constant 0 : i32
    return %c0_i32, %c0_i32_0 : i32, i32
  }
  func.func @transform_2(%arg0: i32) -> (i32, i32) {
    %c0_i32 = arith.constant 0 : i32
    %c0_i32_0 = arith.constant 0 : i32
    %c0_i32_1 = arith.constant 0 : i32
    return %c0_i32, %c0_i32_0 : i32, i32
  }
  func.func @transform_3(%arg0: i32) -> (i32, i32) {
    %c0_i32 = arith.constant 0 : i32
    %c0_i32_0 = arith.constant 0 : i32
    %c0_i32_1 = arith.constant 0 : i32
    return %c0_i32, %c0_i32_0 : i32, i32
  }
  func.func @transform_4(%arg0: i32) -> (i32, i32) {
    %c0_i32 = arith.constant 0 : i32
    %c0_i32_0 = arith.constant 0 : i32
    %c0_i32_1 = arith.constant 0 : i32
    return %c0_i32, %c0_i32_0 : i32, i32
  }
  func.func @transform_5(%arg0: i32) -> (i32, i32) {
    %c0_i32 = arith.constant 0 : i32
    %c0_i32_0 = arith.constant 0 : i32
    %c0_i32_1 = arith.constant 0 : i32
    return %c0_i32, %c0_i32_0 : i32, i32
  }
  func.func @transform_6(%arg0: i32) -> (i32, i32) {
    %c0_i32 = arith.constant 0 : i32
    %c0_i32_0 = arith.constant 0 : i32
    %c0_i32_1 = arith.constant 0 : i32
    return %c0_i32, %c0_i32_0 : i32, i32
  }
  func.func @transform_7(%arg0: i32) -> (i32, i32) {
    %c0_i32 = arith.constant 0 : i32
    %c0_i32_0 = arith.constant 0 : i32
    %c0_i32_1 = arith.constant 0 : i32
    return %c0_i32, %c0_i32_0 : i32, i32
  }
  func.func @transform_8(%arg0: i32) -> (i32, i32) {
    %c0_i32 = arith.constant 0 : i32
    %c0_i32_0 = arith.constant 0 : i32
    %c0_i32_1 = arith.constant 0 : i32
    return %c0_i32, %c0_i32_0 : i32, i32
  }
  func.func @transform_9(%arg0: i32) -> (i32, i32) {
    %c0_i32 = arith.constant 0 : i32
    %c0_i32_0 = arith.constant 0 : i32
    %c0_i32_1 = arith.constant 0 : i32
    return %c0_i32, %c0_i32_0 : i32, i32
  }
  func.func @transform_10(%arg0: i32) -> (i32, i32) {
    %c0_i32 = arith.constant 0 : i32
    %c0_i32_0 = arith.constant 0 : i32
    %c0_i32_1 = arith.constant 0 : i32
    return %c0_i32, %c0_i32_0 : i32, i32
  }
  func.func @transform_11(%arg0: i32) -> (i32, i32) {
    %c0_i32 = arith.constant 0 : i32
    %c0_i32_0 = arith.constant 0 : i32
    %c0_i32_1 = arith.constant 0 : i32
    return %c0_i32, %c0_i32_0 : i32, i32
  }
}

</mosaic_0001>

<bundles_post_ra>
// kernel: tpu_custom_call.1
= control target key start
LH: loop header
LB: loop body
LE: loop exit
PB: predicated region body
PF: predicated region fallthrough
CT: control target
= control target key end

     0   :  { %16 = vsyncpa [#allocation3], 0  ;;  %s1955_s0 = inlined_call_operand.hbm [shape: f32[16,128], index: 0, kind: input, shape index: {}]   ;;  %s1956_s1 = inlined_call_operand.hbm [shape: bf16[128,128], index: 1, kind: input, shape index: {}]   ;;  %s1957_s2 = inlined_call_operand.hbm [shape: bf16[128,128], index: 2, kind: input, shape index: {}]   ;;  %s1958_s3 = inlined_call_operand.hbm [shape: bf16[128,128], index: 3, kind: input, shape index: {}]   ;;  %s1959_s4 = inlined_call_operand.hbm [shape: bf16[128,128], index: 4, kind: input, shape index: {}]   ;;  %s1960_s5 = inlined_call_operand.hbm [shape: f32[1,128], index: 5, kind: input, shape index: {}]   ;;  %s1961_s6 = inlined_call_operand.hbm [shape: f32[1,128], index: 6, kind: input, shape index: {}]   ;;  %s1962_s7 = inlined_call_operand.hbm [shape: f32[1,128], index: 7, kind: input, shape index: {}]   ;;  %s1963_s8 = inlined_call_operand.hbm [shape: f32[1,128], index: 8, kind: input, shape index: {}]   ;;  %s1964_s9 = inlined_call_operand.vmem [shape: f32[8,128], index: 9, kind: input, shape index: {}]   ;;  %s1965_s10 = inlined_call_operand.hbm [shape: f32[8,128], index: 10, kind: input, shape index: {}]   ;;  %s1966_s11 = inlined_call_operand.hbm [shape: f32[16,128], index: 11, kind: output, shape index: {}]  }
   0x1   :  { %17 = vsyncpa [#allocation6], 0 }
   0x2   :  { %18 = vsyncpa [#allocation9], 0 }
   0x3   :  { %19 = vsyncpa [#allocation12], 0 }
   0x4   :  { %20 = vsyncpa [#allocation15], 0 }
   0x5   :  { %21 = vsyncpa [#allocation18], 0  ;;  %s40_s19 = sshll.u32 %s1956_s1, 4  ;;  %s41_s19 = int_to_ptr.hbm [resolvable:$true] %s40_s19 }
   0x6   :  { %22 = vsyncpa [#allocation4], 0  ;;  %s1723_s20 = smov [#allocation5]   ;;  %s66_s24 = sshll.u32 %s1958_s3, 4  ;;  %s67_s24 = int_to_ptr.hbm [resolvable:$true] %s66_s24 }
   0x7   :  { %s42_s21 = sshll.u32 %s1723_s20, 4  ;;  %s1724_s25 = smov 64   ;;  %s43_s21 = int_to_ptr.vmem [resolvable:$true] %s42_s21 }
   0x8   :  { %s1725_s26 = smov 4   ;;  %s1726_s27 = smov [#allocation8]  }
   0x9   :  { %48 = dma.hbm_to_vmem [thread:$0]  %s41_s19, 1024, %s43_s21, [#allocation6], %s1724_s25, %s1724_s25, %s1725_s26  }
   0xa   :  { %s68_s28 = sshll.u32 %s1726_s27, 4  ;;  %s93_s30 = sshll.u32 %s1960_s5, 4  ;;  %s69_s28 = int_to_ptr.vmem [resolvable:$true] %s68_s28  ;;  %s94_s30 = int_to_ptr.hbm [resolvable:$true] %s93_s30 }
   0xb   :  { %74 = dma.hbm_to_vmem [thread:$0]  %s67_s24, 1024, %s69_s28, [#allocation9], %s1724_s25, %s1724_s25, %s1725_s26  }
   0xc   :  { %s115_s13 = sshll.u32 %s1962_s7, 4  ;;  %s1727_s14 = smov [#allocation11]   ;;  %s116_s13 = int_to_ptr.hbm [resolvable:$true] %s115_s13 }
   0xd   :  { %s95_s15 = sshll.u32 %s1727_s14, 4  ;;  %s1728_s16 = smov [#allocation14]   ;;  %s96_s15 = int_to_ptr.vmem [resolvable:$true] %s95_s15 }
   0xe   :  { %98 = dma.hbm_to_vmem [thread:$0]  %s94_s30, 16, %s96_s15, [#allocation12]  }
   0xf   :  { %s117_s17 = sshll.u32 %s1728_s16, 4  ;;  %s27_s5 = sshll.u32 %s1955_s0, 4  ;;  %s118_s17 = int_to_ptr.vmem [resolvable:$true] %s117_s17  ;;  %s28_s5 = int_to_ptr.hbm [resolvable:$true] %s27_s5 }
  0x10   :  { %120 = dma.hbm_to_vmem [thread:$0]  %s116_s13, 16, %s118_s17, [#allocation15]  }
  0x11   :  { %s1729_s20 = smov [#allocation2]   ;;  %s53_s7 = sshll.u32 %s1957_s2, 4  ;;  %s54_s7 = int_to_ptr.hbm [resolvable:$true] %s53_s7 }
  0x12   :  { %s29_s21 = sshll.u32 %s1729_s20, 4  ;;  %s1730_s24 = smov 128   ;;  %s30_s21 = int_to_ptr.vmem [resolvable:$true] %s29_s21 }
  0x13   :  { %s1731_s27 = smov 8   ;;  %s1732_s28 = smov [#allocation7]  }
  0x14   :  { %35 = dma.hbm_to_vmem [thread:$0]  %s28_s5, 256, %s30_s21, [#allocation3], %s1730_s24, %s1730_s24, %s1731_s27  }
  0x15   :  { %s55_s29 = sshll.u32 %s1732_s28, 4  ;;  %s79_s30 = sshll.u32 %s1959_s4, 4  ;;  %s56_s29 = int_to_ptr.vmem [resolvable:$true] %s55_s29  ;;  %s80_s30 = int_to_ptr.hbm [resolvable:$true] %s79_s30 }
  0x16   :  { %61 = dma.hbm_to_vmem [thread:$0]  %s54_s7, 1024, %s56_s29, [#allocation6], %s1724_s25, %s1724_s25, %s1725_s26  }
  0x17   :  { %s104_s12 = sshll.u32 %s1961_s6, 4  ;;  %s1733_s13 = smov [#allocation10]   ;;  %s105_s12 = int_to_ptr.hbm [resolvable:$true] %s104_s12 }
  0x18   :  { %s81_s14 = sshll.u32 %s1733_s13, 4  ;;  %s1734_s15 = smov [#allocation13]   ;;  %s82_s14 = int_to_ptr.vmem [resolvable:$true] %s81_s14 }
  0x19   :  { %87 = dma.hbm_to_vmem [thread:$0]  %s80_s30, 1024, %s82_s14, [#allocation9], %s1724_s25, %s1724_s25, %s1725_s26  }
  0x1a   :  { %s106_s4 = sshll.u32 %s1734_s15, 4  ;;  %s126_s18 = sshll.u32 %s1963_s8, 4  ;;  %s107_s4 = int_to_ptr.vmem [resolvable:$true] %s106_s4  ;;  %s127_s18 = int_to_ptr.hbm [resolvable:$true] %s126_s18 }
  0x1b   :  { %109 = dma.hbm_to_vmem [thread:$0]  %s105_s12, 16, %s107_s4, [#allocation12]  }
  0x1c   :  { %s139_s6 = sshll.u32 %s1965_s10, 4  ;;  %s1735_s20 = smov [#allocation16]   ;;  %s140_s6 = int_to_ptr.hbm [resolvable:$true] %s139_s6 }
  0x1d   :  { %s128_s21 = sshll.u32 %s1735_s20, 4  ;;  %s1736_s22 = smov [#allocation17]   ;;  %s129_s21 = int_to_ptr.vmem [resolvable:$true] %s128_s21 }
  0x1e   :  { %131 = dma.hbm_to_vmem [thread:$0]  %s127_s18, 16, %s129_s21, [#allocation15]  }
  0x1f   :  { %s141_s26 = sshll.u32 %s1736_s22, 4  ;;  %s142_s26 = int_to_ptr.vmem [resolvable:$true] %s141_s26 }
  0x20   :  { %144 = dma.hbm_to_vmem [thread:$0]  %s140_s6, 128, %s142_s26, [#allocation18]  }
  0x21   :  { %1709 = dma.done.wait [#allocation3], 256  }
  0x22   :  { %1710 = vsyncadd [#allocation3], 4294967040 }
  0x23   :  { %1711 = dma.done.wait [#allocation6], 2048  }
  0x24   :  { %1712 = vsyncadd [#allocation6], 4294965248 }
  0x25   :  { %1713 = dma.done.wait [#allocation9], 2048  }
  0x26   :  { %1714 = vsyncadd [#allocation9], 4294965248 }
  0x27   :  { %1715 = dma.done.wait [#allocation12], 32  }
  0x28   :  { %1716 = vsyncadd [#allocation12], 4294967264 }
  0x29   :  { %1717 = dma.done.wait [#allocation15], 32  }
  0x2a   :  { %1718 = vsyncadd [#allocation15], 4294967264 }
  0x2b   :  { %1719 = dma.done.wait [#allocation18], 128  }
  0x2c   :  { %1720 = vsyncadd [#allocation18], 4294967168  ;;  %v1337_v0 = vld [vmem:[#allocation5 + $0x38] sm:$0xff]  ;;  %v1336_v2 = vld [vmem:[#allocation5 + $0x30] sm:$0xff]  ;;  %vm434_vm0 = vcmask 261120   ;;  %s1737_s8 = smov 96  }
  0x2d   :  { %v1345_v1 = vld [vmem:[#allocation7 + $0x38] sm:$0xff]  ;;  %256 = vmatpush.bf16.msra.mxu0 %v1337_v0  ;;  %v1344_v3 = vld [vmem:[#allocation7 + $0x30] sm:$0xff]  ;;  %v1335_v4 = vld [vmem:[#allocation5 + $0x28] sm:$0xff]  ;;  %vm461_vm1 = vcmask 64512   ;;  %s1738_s10 = smov 32   ;;  %vm705_vm2 = vcmask 523264  }
  0x2e   :  { %338 = vmatpush.bf16.msra.mxu1 %v1345_v1  ;;  %v1343_v5 = vld [vmem:[#allocation7 + $0x28] sm:$0xff]  ;;  %v1353_v6 = vld [vmem:[#allocation8 + $0x38] sm:$0xff]  ;;  %v1352_v7 = vld [vmem:[#allocation8 + $0x30] sm:$0xff]  ;;  %vm707_vm3 = vcmask 785408   ;;  %s1160_s3 = sshll.u32 %s1966_s11, 4  ;;  %s1161_s3 = int_to_ptr.hbm [resolvable:$true] %s1160_s3 }
  0x2f   :  { %420 = vmatpush.bf16.msra.mxu2 %v1353_v6  ;;  %v1334_v8 = vld [vmem:[#allocation5 + $0x20] sm:$0xff]  ;;  %v1351_v10 = vld [vmem:[#allocation8 + $0x28] sm:$0xff]  ;;  %v1333_v11 = vld [vmem:[#allocation5 + $0x18] sm:$0xff] }
  0x30   :  { %v1342_v9 = vld [vmem:[#allocation7 + $0x20] sm:$0xff]  ;;  %v1341_v12 = vld [vmem:[#allocation7 + $0x18] sm:$0xff]  ;;  %v1332_v14 = vld [vmem:[#allocation5 + $0x10] sm:$0xff] }
  0x31   :  { %257 = vmatpush.bf16.msra.mxu0 %v1336_v2  ;;  %v1350_v13 = vld [vmem:[#allocation8 + $0x20] sm:$0xff]  ;;  %v1340_v15 = vld [vmem:[#allocation7 + $0x10] sm:$0xff]  ;;  %v1349_v16 = vld [vmem:[#allocation8 + $0x18] sm:$0xff] }
  0x32   :  { %339 = vmatpush.bf16.msra.mxu1 %v1344_v3  ;;  %v1331_v17 = vld [vmem:[#allocation5 + $0x8] sm:$0xff]  ;;  %v1348_v19 = vld [vmem:[#allocation8 + $0x10] sm:$0xff]  ;;  %v1330_v20 = vld [vmem:[#allocation5] sm:$0xff] }
  0x33   :  { %421 = vmatpush.bf16.msra.mxu2 %v1352_v7  ;;  %v1339_v18 = vld [vmem:[#allocation7 + $0x8] sm:$0xff]  ;;  %v1338_v21 = vld [vmem:[#allocation7] sm:$0xff]  ;;  %v1846_v22 = vld [vmem:[#allocation2] sm:$0xff] }
  0x34   :  { %v1848_v23 = vld [vmem:[#allocation2 + $0x8] sm:$0xff]  ;;  %v1347_v24 = vld [vmem:[#allocation8 + $0x8] sm:$0xff]  ;;  %v1346_v26 = vld [vmem:[#allocation8] sm:$0xff] }
  0x35   :  { %258 = vmatpush.bf16.msra.mxu0 %v1335_v4  ;;  %v187_v25 = vpack.c.bf16 %v1848_v23, %v1846_v22  ;;  %v1404_v27 = vld [vmem:[#allocation13] ss:$0 sm:$0xff]  ;;  %v1852_v28 = vld [vmem:[#allocation11] ss:$0 sm:$0xff]  ;;  %v1858_v33 = vld [vmem:[#allocation14] ss:$0 sm:$0xff] }
  0x36   :  { %340 = vmatpush.bf16.msra.mxu1 %v1343_v5 }
  0x37   :  { %422 = vmatpush.bf16.msra.mxu2 %v1351_v10 }
  0x39   :  { %259 = vmatpush.bf16.msra.mxu0 %v1334_v8 }
  0x3a   :  { %341 = vmatpush.bf16.msra.mxu1 %v1342_v9 }
  0x3b   :  { %423 = vmatpush.bf16.msra.mxu2 %v1350_v13 }
  0x3d   :  { %260 = vmatpush.bf16.msra.mxu0 %v1333_v11 }
  0x3e   :  { %342 = vmatpush.bf16.msra.mxu1 %v1341_v12 }
  0x3f   :  { %424 = vmatpush.bf16.msra.mxu2 %v1349_v16 }
  0x41   :  { %261 = vmatpush.bf16.msra.mxu0 %v1332_v14 }
  0x42   :  { %343 = vmatpush.bf16.msra.mxu1 %v1340_v15 }
  0x43   :  { %425 = vmatpush.bf16.msra.mxu2 %v1348_v19 }
  0x45   :  { %262 = vmatpush.bf16.msra.mxu0 %v1331_v17 }
  0x46   :  { %344 = vmatpush.bf16.msra.mxu1 %v1339_v18 }
  0x47   :  { %426 = vmatpush.bf16.msra.mxu2 %v1347_v24 }
  0x49   :  { %263 = vmatpush.bf16.msra.mxu0 %v1330_v20 }
  0x4a   :  { %345 = vmatpush.bf16.msra.mxu1 %v1338_v21 }
  0x4b   :  { %427 = vmatpush.bf16.msra.mxu2 %v1346_v26 }
  0x4c   :  { %264 = vmatmul.bf16.vlgmr.msra.gmra.mxu0 %v187_v25 }
  0x4d   :  { %346 = vmatmul.bf16.vlgmr.msra.gmra.mxu1 %v187_v25 }
  0x4e   :  { %428 = vmatmul.bf16.vlgmr.msra.gmra.mxu2 %v187_v25 }
  0xc9   :  { %v265_v30 = vpop.f32.mrf.mxu0 }
  0xca   :  { %v347_v29 = vpop.f32.mrf.mxu1  ;;  %v266_v32 = vadd.f32 %v1852_v28, %v265_v30 }
  0xcb   :  { %v348_v31 = vadd.f32 %v1404_v27, %v347_v29 }
  0xcd   :  { %498 = vrot.lane.b32.xlu1 %v348_v31, %s1737_s8  ;;  %1274 = vmatpush.xpose.msk.msra.mxu3 %vm434_vm0, %v348_v31 }
  0xd0   :  { %1275 = vmatmul.msk.f32.vlgmr.msra.gmra.mxu3 %vm434_vm0, %v266_v32 }
  0xd1   :  { %v429_v34 = vpop.f32.mrf.mxu2  ;;  %v267_v60 = vpop.f32.mrf.mxu0 }
  0xd2   :  { %v1862_v35 = vadd.f32 %v1858_v33, %v429_v34  ;;  %v349_v58 = vpop.f32.mrf.mxu1  ;;  %v268_v61 = vadd.f32 %v1852_v28, %v267_v60 }
  0xd3   :  { %v350_v59 = vadd.f32 %v1404_v27, %v349_v58 }
  0xd4   :  { %491 = vmatpush.msrb.mxu3 %v1862_v35 }
  0xd5   :  { %496 = vrot.lane.b32.xlu1 %v266_v32, %s1737_s8 }
  0xd9   :  { %v431_v20 = vpop.f32.mrf.mxu2 }
  0xda   :  { %v1905_v25 = vadd.f32 %v1858_v33, %v431_v20  ;;  %v1360_v20 = vld [vmem:[#allocation10 + $0x30] sm:$0xff] }
  0xdd   :  { %564 = vrot.lane.b32.xlu1 %v348_v31, %s1724_s25 }
 0x13f   :  { %v499_v36 = vpop.permute.xlu1 %498 }
 0x140   :  { %1277 = vmatpush.xpose.msk.msra.mxu3 %vm434_vm0, %v499_v36 }
 0x147   :  { %v497_v47 = vpop.permute.xlu1 %496 }
 0x14f   :  { %v565_v49 = vpop.permute.xlu1 %564 }
 0x153   :  { %v458_v37 = vpop.f32.mrf.mxu3 }
 0x154   :  { %v462_v38 = vsel %vm461_vm1, %v458_v37, -inf }
 0x155   :  { %463 = vmax.xlane.f32.xlu0 %v462_v38 }
 0x1c8   :  { %v464_v39 = vpop.xlane.xlu0 %463 }
 0x1c9   :  { %v465_v40 = vsub.f32 %v458_v37, %v464_v39 }
 0x1cb   :  { %v466_v41 = vmul.f32 1.442695, %v465_v40 }
 0x1cd   :  { %1407 = vpow2.f32 %v466_v41 }
 0x1d3   :  { %v1408_v42 = vpop.eup %1407 }
 0x1d4   :  { %v468_v43 = vsel %vm461_vm1, %v1408_v42, 0.0 }
 0x1d5   :  { %469 = vadd.xlane.f32.xlu0 %v468_v43 }
 0x1e9   :  { %536 = vrot.lane.b32.xlu0 %v1862_v35, %s1737_s8 }
 0x248   :  { %v470_v44 = vpop.xlane.xlu0 %469 }
 0x249   :  { %1409 = vrcp.f32 %v470_v44 }
 0x24f   :  { %v1410_v45 = vpop.eup %1409 }
 0x250   :  { %v472_v46 = vmul.f32 %v1410_v45, %v1408_v42 }
 0x252   :  { %1276 = vmatmul.msk.f32.vlgmr.msrb.gmra.mxu3 %vm461_vm1, %v472_v46 }
 0x25a   :  { %1278 = vmatmul.msk.f32.vlgmr.msra.gmra.mxu3 %vm434_vm0, %v497_v47 }
 0x25b   :  { %v537_v48 = vpop.permute.xlu0 %536 }
 0x25c   :  { %557 = vmatpush.msrb.mxu3 %v537_v48 }
 0x25e   :  { %1280 = vmatpush.xpose.msk.msra.mxu3 %vm434_vm0, %v565_v49 }
 0x2d5   :  { %v1874_v50 = vpop.f32.mrf.mxu3 }
 0x2dd   :  { %v521_v51 = vpop.f32.mrf.mxu3 }
 0x2de   :  { %v524_v52 = vsel %vm461_vm1, %v521_v51, -inf }
 0x2df   :  { %525 = vmax.xlane.f32.xlu2 %v524_v52 }
 0x352   :  { %v526_v53 = vpop.xlane.xlu2 %525 }
 0x353   :  { %v527_v54 = vsub.f32 %v521_v51, %v526_v53 }
 0x355   :  { %v528_v55 = vmul.f32 1.442695, %v527_v54 }
 0x357   :  { %1411 = vpow2.f32 %v528_v55 }
 0x35d   :  { %v1412_v56 = vpop.eup %1411 }
 0x35e   :  { %v530_v57 = vsel %vm461_vm1, %v1412_v56, 0.0 }
 0x35f   :  { %531 = vadd.xlane.f32.xlu2 %v530_v57 }
 0x377   :  { %562 = vrot.lane.b32.xlu2 %v266_v32, %s1724_s25 }
 0x37f   :  { %601 = vrot.lane.b32.xlu2 %v1862_v35, %s1724_s25 }
 0x387   :  { %629 = vrot.lane.b32.xlu2 %v348_v31, %s1738_s10 }
 0x38f   :  { %627 = vrot.lane.b32.xlu2 %v266_v32, %s1738_s10 }
 0x397   :  { %771 = vrot.lane.b32.xlu2 %v350_v59, %s1737_s8 }
 0x39f   :  { %837 = vrot.lane.b32.xlu2 %v350_v59, %s1724_s25 }
 0x3a7   :  { %902 = vrot.lane.b32.xlu2 %v350_v59, %s1738_s10 }
 0x3af   :  { %900 = vrot.lane.b32.xlu2 %v268_v61, %s1738_s10 }
 0x3d2   :  { %v532_v62 = vpop.xlane.xlu2 %531 }
 0x3d3   :  { %1413 = vrcp.f32 %v532_v62 }
 0x3d9   :  { %v1414_v63 = vpop.eup %1413 }
 0x3da   :  { %v534_v0 = vmul.f32 %v1414_v63, %v1412_v56  ;;  %v563_v1 = vpop.permute.xlu2 %562 }
 0x3dc   :  { %1279 = vmatmul.msk.f32.vlgmr.msrb.gmra.mxu3 %vm461_vm1, %v534_v0 }
 0x3e2   :  { %v602_v2 = vpop.permute.xlu2 %601 }
 0x3e3   :  { %622 = vmatpush.msrb.mxu3 %v602_v2 }
 0x3e4   :  { %1281 = vmatmul.msk.f32.vlgmr.msra.gmra.mxu3 %vm434_vm0, %v563_v1 }
 0x3e5   :  { %1286 = vmatpush.xpose.msk.msra.mxu3 %vm434_vm0, %v350_v59 }
 0x3ea   :  { %v630_v3 = vpop.permute.xlu2 %629 }
 0x3eb   :  { %1283 = vmatpush.xpose.msk.msrb.mxu0 %vm434_vm0, %v630_v3 }
 0x3f2   :  { %v628_v4 = vpop.permute.xlu2 %627 }
 0x3f3   :  { %1284 = vmatmul.msk.f32.vlgmr.msrb.gmra.mxu0 %vm434_vm0, %v628_v4 }
 0x3fa   :  { %v772_v5 = vpop.permute.xlu2 %771 }
 0x3fb   :  { %1289 = vmatpush.xpose.msk.msra.mxu0 %vm434_vm0, %v772_v5 }
 0x402   :  { %v838_v6 = vpop.permute.xlu2 %837 }
 0x403   :  { %1292 = vmatpush.xpose.msk.msrb.mxu0 %vm434_vm0, %v838_v6 }
 0x40a   :  { %v903_v18 = vpop.permute.xlu2 %902 }
 0x412   :  { %v901_v32 = vpop.permute.xlu2 %900 }
 0x45f   :  { %v1895_v7 = vpop.f32.mrf.mxu3 }
 0x467   :  { %v587_v8 = vpop.f32.mrf.mxu3 }
 0x468   :  { %v590_v9 = vsel %vm461_vm1, %v587_v8, -inf }
 0x469   :  { %591 = vmax.xlane.f32.xlu1 %v590_v9 }
 0x470   :  { %v652_v10 = vpop.f32.mrf.mxu0 }
 0x471   :  { %v655_v11 = vsel %vm461_vm1, %v652_v10, -inf }
 0x482   :  { %769 = vrot.lane.b32.xlu1 %v268_v61, %s1737_s8 }
 0x4ac   :  { %656 = vmax.xlane.f32.xlu1 %v655_v11 }
 0x4dc   :  { %v592_v12 = vpop.xlane.xlu1 %591 }
 0x4dd   :  { %v593_v13 = vsub.f32 %v587_v8, %v592_v12 }
 0x4df   :  { %v594_v14 = vmul.f32 1.442695, %v593_v13 }
 0x4e1   :  { %1415 = vpow2.f32 %v594_v14 }
 0x4e7   :  { %v1416_v15 = vpop.eup %1415 }
 0x4e8   :  { %v596_v16 = vsel %vm461_vm1, %v1416_v15, 0.0 }
 0x4e9   :  { %597 = vadd.xlane.f32.xlu0 %v596_v16 }
 0x4f4   :  { %v770_v17 = vpop.permute.xlu1 %769 }
 0x4f5   :  { %1290 = vmatmul.msk.f32.vlgmr.msra.gmra.mxu0 %vm434_vm0, %v770_v17 }
 0x4f6   :  { %1295 = vmatpush.xpose.msk.msra.mxu0 %vm434_vm0, %v903_v18 }
 0x4fd   :  { %835 = vrot.lane.b32.xlu0 %v268_v61, %s1724_s25 }
 0x51f   :  { %v657_v26 = vpop.xlane.xlu1 %656 }
 0x520   :  { %v658_v27 = vsub.f32 %v652_v10, %v657_v26 }
 0x522   :  { %v659_v28 = vmul.f32 1.442695, %v658_v27 }
 0x55c   :  { %v598_v19 = vpop.xlane.xlu0 %597 }
 0x55d   :  { %1417 = vrcp.f32 %v598_v19  ;;  %v1361_v19 = vld [vmem:[#allocation10 + $0x38] sm:$0xff] }
 0x55e   :  { %1419 = vpow2.f32 %v659_v28  ;;  %1049 = vmatpush.bf16.msrb.mxu2 %v1361_v19 }
 0x562   :  { %1050 = vmatpush.bf16.msrb.mxu2 %v1360_v20 }
 0x563   :  { %v1418_v21 = vpop.eup %1417 }
 0x564   :  { %v600_v24 = vmul.f32 %v1418_v21, %v1416_v15  ;;  %v1420_v33 = vpop.eup %1419  ;;  %v1359_v21 = vld [vmem:[#allocation10 + $0x28] sm:$0xff] }
 0x565   :  { %v661_v34 = vsel %vm461_vm1, %v1420_v33, 0.0 }
 0x566   :  { %1282 = vmatmul.msk.f32.vlgmr.msrb.gmra.mxu3 %vm461_vm1, %v600_v24  ;;  %1051 = vmatpush.bf16.msrb.mxu2 %v1359_v21  ;;  %v1358_v24 = vld [vmem:[#allocation10 + $0x20] sm:$0xff] }
 0x567   :  { %764 = vmatpush.msrb.mxu3 %v1905_v25 }
 0x56a   :  { %1052 = vmatpush.bf16.msrb.mxu2 %v1358_v24 }
 0x56e   :  { %1287 = vmatmul.msk.f32.vlgmr.msra.gmra.mxu3 %vm434_vm0, %v268_v61 }
 0x56f   :  { %v836_v29 = vpop.permute.xlu0 %835 }
 0x570   :  { %1293 = vmatmul.msk.f32.vlgmr.msrb.gmra.mxu0 %vm434_vm0, %v836_v29 }
 0x572   :  { %v794_v30 = vpop.f32.mrf.mxu0 }
 0x573   :  { %v797_v31 = vsel %vm461_vm1, %v794_v30, -inf }
 0x574   :  { %798 = vmax.xlane.f32.xlu0 %v797_v31 }
 0x578   :  { %1296 = vmatmul.msk.f32.vlgmr.msra.gmra.mxu0 %vm434_vm0, %v901_v32 }
 0x57c   :  { %662 = vadd.xlane.f32.xlu0 %v661_v34  ;;  %v1356_v34 = vld [vmem:[#allocation10 + $0x10] sm:$0xff] }
 0x590   :  { %666 = vrot.lane.b32.xlu0 %v1862_v35, %s1738_s10 }
 0x598   :  { %939 = vrot.lane.b32.xlu0 %v1905_v25, %s1738_s10 }
 0x5e7   :  { %v799_v37 = vpop.xlane.xlu0 %798 }
 0x5e8   :  { %v800_v40 = vsub.f32 %v794_v30, %v799_v37  ;;  %v1355_v37 = vld [vmem:[#allocation10 + $0x8] sm:$0xff] }
 0x5e9   :  { %v1918_v36 = vpop.f32.mrf.mxu3 }
 0x5ea   :  { %v801_v43 = vmul.f32 1.442695, %v800_v40 }
 0x5ec   :  { %1421 = vpow2.f32 %v801_v43 }
 0x5ed   :  { %v860_v38 = vpop.f32.mrf.mxu0 }
 0x5ee   :  { %v863_v39 = vsel %vm461_vm1, %v860_v38, -inf }
 0x5ef   :  { %864 = vmax.xlane.f32.xlu1 %v863_v39  ;;  %v663_v44 = vpop.xlane.xlu0 %662 }
 0x5f0   :  { %1423 = vrcp.f32 %v663_v44 }
 0x5f1   :  { %v732_v41 = vpop.f32.mrf.mxu3 }
 0x5f2   :  { %v735_v42 = vsel %vm461_vm1, %v732_v41, -inf  ;;  %v1422_v46 = vpop.eup %1421 }
 0x5f3   :  { %736 = vmax.xlane.f32.xlu2 %v735_v42  ;;  %v803_v49 = vsel %vm461_vm1, %v1422_v46, 0.0 }
 0x5f5   :  { %v925_v45 = vpop.f32.mrf.mxu0 }
 0x5f6   :  { %v928_v35 = vsel %vm461_vm1, %v925_v45, -inf  ;;  %v1424_v47 = vpop.eup %1423 }
 0x5f7   :  { %v665_v51 = vmul.f32 %v1424_v47, %v1420_v33  ;;  %v1357_v33 = vld [vmem:[#allocation10 + $0x18] sm:$0xff] }
 0x5f8   :  { %1053 = vmatpush.bf16.msrb.mxu2 %v1357_v33 }
 0x5fb   :  { %929 = vmax.xlane.f32.xlu2 %v928_v35 }
 0x5fc   :  { %1054 = vmatpush.bf16.msrb.mxu2 %v1356_v34 }
 0x600   :  { %1055 = vmatpush.bf16.msrb.mxu2 %v1355_v37 }
 0x602   :  { %v667_v48 = vpop.permute.xlu0 %666 }
 0x603   :  { %804 = vadd.xlane.f32.xlu2 %v803_v49  ;;  %687 = vmatpush.msrb.mxu1 %v667_v48 }
 0x604   :  { %1285 = vmatmul.msk.f32.vlgmr.msrb.gmra.mxu1 %vm461_vm1, %v665_v51 }
 0x60a   :  { %v940_v16 = vpop.permute.xlu0 %939 }
 0x662   :  { %v865_v52 = vpop.xlane.xlu1 %864 }
 0x663   :  { %v866_v53 = vsub.f32 %v860_v38, %v865_v52  ;;  %v1354_v38 = vld [vmem:[#allocation10] sm:$0xff] }
 0x664   :  { %1056 = vmatpush.bf16.msrb.mxu2 %v1354_v38 }
 0x665   :  { %v867_v54 = vmul.f32 1.442695, %v866_v53  ;;  %v1406_v53 = vld [vmem:[#allocation16] ss:$0 sm:$0xff] }
 0x666   :  { %v737_v55 = vpop.xlane.xlu2 %736 }
 0x667   :  { %1425 = vpow2.f32 %v867_v54  ;;  %v738_v56 = vsub.f32 %v732_v41, %v737_v55 }
 0x669   :  { %v739_v57 = vmul.f32 1.442695, %v738_v56 }
 0x66b   :  { %1427 = vpow2.f32 %v739_v57 }
 0x66d   :  { %v1426_v58 = vpop.eup %1425 }
 0x66e   :  { %v930_v59 = vpop.xlane.xlu2 %929  ;;  %v869_v60 = vsel %vm461_vm1, %v1426_v58, 0.0 }
 0x66f   :  { %v931_v61 = vsub.f32 %v925_v45, %v930_v59  ;;  %870 = vadd.xlane.f32.xlu1 %v869_v60 }
 0x671   :  { %v932_v62 = vmul.f32 1.442695, %v931_v61  ;;  %v1428_v63 = vpop.eup %1427 }
 0x672   :  { %v741_v0 = vsel %vm461_vm1, %v1428_v63, 0.0 }
 0x673   :  { %1429 = vpow2.f32 %v932_v62 }
 0x676   :  { %v805_v4 = vpop.xlane.xlu2 %804 }
 0x677   :  { %742 = vadd.xlane.f32.xlu1 %v741_v0  ;;  %v1739_v0 = vmov 1024.0  }
 0x679   :  { %v1430_v1 = vpop.eup %1429 }
 0x67a   :  { %v934_v2 = vsel %vm461_vm1, %v1430_v1, 0.0 }
 0x67b   :  { %935 = vadd.xlane.f32.xlu2 %v934_v2 }
 0x681   :  { %v689_v26 = vpop.f32.mrf.mxu1 }
 0x690   :  { %809 = vrot.lane.b32.xlu1 %v1905_v25, %s1737_s8 }
 0x693   :  { %874 = vrot.lane.b32.xlu2 %v1905_v25, %s1724_s25 }
 0x6e2   :  { %v871_v3 = vpop.xlane.xlu1 %870 }
 0x6ea   :  { %v743_v5 = vpop.xlane.xlu1 %742 }
 0x6eb   :  { %1431 = vrcp.f32 %v743_v5 }
 0x6ec   :  { %1433 = vrcp.f32 %v871_v3 }
 0x6ed   :  { %1435 = vrcp.f32 %v805_v4 }
 0x6ee   :  { %v936_v6 = vpop.xlane.xlu2 %935 }
 0x6ef   :  { %1437 = vrcp.f32 %v936_v6 }
 0x6f0   :  { %1439 = vrcp.f32 %v1739_v0 }
 0x6f1   :  { %v1432_v8 = vpop.eup %1431 }
 0x6f2   :  { %v745_v9 = vmul.f32 %v1432_v8, %v1428_v63  ;;  %v1434_v11 = vpop.eup %1433 }
 0x6f3   :  { %v873_v12 = vmul.f32 %v1434_v11, %v1426_v58  ;;  %v1436_v13 = vpop.eup %1435 }
 0x6f4   :  { %1288 = vmatmul.msk.f32.vlgmr.msrb.gmra.mxu3 %vm461_vm1, %v745_v9  ;;  %v807_v14 = vmul.f32 %v1436_v13, %v1422_v46 }
 0x6f5   :  { %v1438_v17 = vpop.eup %1437 }
 0x6f6   :  { %v875_v10 = vpop.permute.xlu2 %874  ;;  %v938_v18 = vmul.f32 %v1438_v17, %v1430_v1  ;;  %v1440_v1 = vpop.eup %1439 }
 0x6f7   :  { %895 = vmatpush.msra.mxu3 %v875_v10  ;;  %v1076_v2 = vmul.f32 1024.0, %v1440_v1  ;;  %vm1080_vm4 = vweird.f32 %v1440_v1 }
 0x6f9   :  { %v1077_v3 = vsub.f32 1.0, %v1076_v2 }
 0x6fb   :  { %v1078_v4 = vmul.f32 %v1440_v1, %v1077_v3 }
 0x6fc   :  { %1294 = vmatmul.msk.f32.vlgmr.msra.gmra.mxu3 %vm461_vm1, %v873_v12 }
 0x6fd   :  { %v1079_v5 = vadd.f32 %v1440_v1, %v1078_v4 }
 0x6ff   :  { %v1081_v6 = vsel %vm1080_vm4, %v1440_v1, %v1079_v5 }
 0x702   :  { %v810_v15 = vpop.permute.xlu1 %809 }
 0x703   :  { %830 = vmatpush.msra.mxu1 %v810_v15 }
 0x704   :  { %1291 = vmatmul.msk.f32.vlgmr.msra.gmra.mxu1 %vm461_vm1, %v807_v14 }
 0x705   :  { %960 = vmatpush.msrb.mxu1 %v940_v16 }
 0x70c   :  { %1297 = vmatmul.msk.f32.vlgmr.msrb.gmra.mxu1 %vm461_vm1, %v938_v18 }
 0x777   :  { %v766_v25 = vpop.f32.mrf.mxu3 }
 0x77f   :  { %v897_v27 = vpop.f32.mrf.mxu3 }
 0x780   :  { %v1393_v28 = vpack.i.bf16 %v897_v27, %v1918_v36 }
 0x781   :  { %v832_v29 = vpop.f32.mrf.mxu1 }
 0x782   :  { %v1388_v30 = vpack.i.bf16 %v832_v29, %v1895_v7  ;;  %1394 = vrot.lane.b32.xlu1 %v1393_v28, %s1724_s25 }
 0x784   :  { %1389 = vrot.lane.b32.xlu0 %v1388_v30, %s1738_s10 }
 0x789   :  { %v962_v31 = vpop.f32.mrf.mxu1 }
 0x78a   :  { %v1398_v32 = vpack.i.bf16 %v962_v31, %v689_v26 }
 0x78c   :  { %1399 = vrot.lane.b32.xlu0 %v1398_v32, %s1737_s8 }
 0x7f4   :  { %v1395_v7 = vpop.permute.xlu1 %1394 }
 0x7f5   :  { %v1397_v43 = vunpack.i.h.bf16 %v1395_v7  ;;  %v1396_v44 = vunpack.i.l.bf16 %v1395_v7 }
 0x7f6   :  { %v1390_v36 = vpop.permute.xlu0 %1389 }
 0x7f7   :  { %v1392_v39 = vunpack.i.h.bf16 %v1390_v36  ;;  %v1391_v40 = vunpack.i.l.bf16 %v1390_v36 }
 0x7f9   :  { %v977_v41 = vsel %vm434_vm0, %v766_v25, %v1392_v39  ;;  %v704_v42 = vsel %vm434_vm0, %v1874_v50, %v1391_v40 }
 0x7fa   :  { %v706_v47 = vsel %vm705_vm2, %v704_v42, %v1396_v44  ;;  %v978_v48 = vsel %vm705_vm2, %v977_v41, %v1397_v43  ;;  %v1063_v42 = vld [vmem:[%s1964_s9] sm:$0xff]  ;;  %v1064_v44 = vld [vmem:[#allocation17] sm:$0xff]  ;;  %s1740_s9 = smov [#allocation19]  }
 0x7fb   :  { %s1158_s1 = sshll.u32 %s1740_s9, 4  ;;  %s1159_s1 = int_to_ptr.vmem [resolvable:$true] %s1158_s1 }
 0x7fe   :  { %v1400_v45 = vpop.permute.xlu0 %1399 }
 0x7ff   :  { %v1402_v35 = vunpack.i.h.bf16 %v1400_v45  ;;  %v1401_v46 = vunpack.i.l.bf16 %v1400_v45 }
 0x801   :  { %v708_v49 = vsel %vm707_vm3, %v706_v47, %v1401_v46  ;;  %v979_v51 = vsel %vm707_vm3, %v978_v48, %v1402_v35 }
 0x802   :  { %v980_v52 = vpack.c.bf16 %v979_v51, %v708_v49 }
 0x804   :  { %1057 = vmatmul.bf16.vlgmr.msrb.gmra.mxu2 %v980_v52 }
 0x887   :  { %v1058_v54 = vpop.f32.mrf.mxu2 }
 0x888   :  { %v1059_v55 = vadd.f32 %v1406_v53, %v1058_v54 }
 0x88a   :  { %1065 = vadd.xlane.f32.xlu2 %v1059_v55 }
 0x88f   :  { %v1060_v56 = vpop.f32.mrf.mxu2 }
 0x890   :  { %v1061_v57 = vadd.f32 %v1406_v53, %v1060_v56 }
 0x892   :  { %1113 = vadd.xlane.f32.xlu0 %v1061_v57 }
 0x8fd   :  { %v1066_v50 = vpop.xlane.xlu2 %1065 }
 0x8fe   :  { %v1067_v58 = vrot.slane %v1066_v50, 4 }
 0x900   :  { %v1068_v59 = vadd.f32 %v1067_v58, %v1066_v50 }
 0x902   :  { %v1069_v60 = vrot.slane %v1068_v59, 2 }
 0x904   :  { %v1070_v61 = vadd.f32 %v1069_v60, %v1068_v59 }
 0x905   :  { %v1114_v12 = vpop.xlane.xlu0 %1113 }
 0x906   :  { %v1071_v62 = vrot.slane %v1070_v61, 1  ;;  %v1115_v13 = vrot.slane %v1114_v12, 4 }
 0x908   :  { %v1072_v63 = vadd.f32 %v1071_v62, %v1070_v61  ;;  %v1116_v14 = vadd.f32 %v1115_v13, %v1114_v12 }
 0x90a   :  { %1362 = vpush %v1072_v63  ;;  %v1117_v15 = vrot.slane %v1116_v14, 2 }
 0x90c   :  { %v1118_v19 = vadd.f32 %v1117_v15, %v1116_v14 }
 0x90e   :  { %v1119_v24 = vrot.slane %v1118_v19, 1 }
 0x910   :  { %v1120_v27 = vadd.f32 %v1119_v24, %v1118_v19 }
 0x93b   :  { %s1363_s25 = spop %1362 }
 0x93c   :  { %v1074_v8 = vstv %s1363_s25 }
 0x93d   :  { %v1082_v9 = vmul.f32 %v1081_v6, %v1074_v8 }
 0x93f   :  { %v1083_v10 = vsub.f32 %v1059_v55, %v1082_v9 }
 0x941   :  { %v1084_v11 = vmul.f32 %v1083_v10, %v1083_v10 }
 0x943   :  { %1085 = vadd.xlane.f32.xlu1 %v1084_v11 }
 0x9b6   :  { %v1086_v16 = vpop.xlane.xlu1 %1085 }
 0x9b7   :  { %v1087_v17 = vrot.slane %v1086_v16, 4 }
 0x9b9   :  { %v1088_v18 = vadd.f32 %v1087_v17, %v1086_v16 }
 0x9bb   :  { %v1089_v20 = vrot.slane %v1088_v18, 2 }
 0x9bd   :  { %v1090_v21 = vadd.f32 %v1089_v20, %v1088_v18 }
 0x9bf   :  { %v1091_v25 = vrot.slane %v1090_v21, 1 }
 0x9c1   :  { %v1092_v26 = vadd.f32 %v1091_v25, %v1090_v21 }
 0x9c3   :  { %1364 = vpush %v1092_v26 }
 0x9c4   :  { %1366 = vpush %v1120_v27 }
 0x9f4   :  { %s1365_s23 = spop %1364 }
 0x9f5   :  { %v1094_v28 = vstv %s1365_s23  ;;  %s1367_s7 = spop %1366 }
 0x9f6   :  { %v1095_v29 = vmul.f32 %v1094_v28, %v1081_v6  ;;  %v1122_v30 = vstv %s1367_s7 }
 0x9f7   :  { %v1123_v31 = vmul.f32 %v1122_v30, %v1081_v6 }
 0x9f8   :  { %v1096_v32 = vadd.f32 1e-05, %v1095_v29 }
 0x9f9   :  { %v1124_v33 = vsub.f32 %v1061_v57, %v1123_v31 }
 0x9fa   :  { %1441 = vrsqrt.f32 %v1096_v32  ;;  %vm1103_vm6 = vweird.f32 %v1096_v32 }
 0x9fb   :  { %v1125_v34 = vmul.f32 %v1124_v33, %v1124_v33 }
 0x9fd   :  { %1126 = vadd.xlane.f32.xlu2 %v1125_v34 }
 0xa00   :  { %v1442_v37 = vpop.eup %1441 }
 0xa01   :  { %v1098_v38 = vmul.f32 %v1442_v37, %v1096_v32  ;;  %vm1104_vm5 = vweird.f32 %v1442_v37 }
 0xa02   :  { %vm1105_vm7 = vmor %vm1103_vm6, %vm1104_vm5 }
 0xa03   :  { %v1099_v36 = vmul.f32 %v1442_v37, %v1098_v38 }
 0xa05   :  { %v1100_v39 = vmul.f32 0.5, %v1099_v36 }
 0xa07   :  { %v1101_v40 = vsub.f32 1.5, %v1100_v39 }
 0xa09   :  { %v1102_v7 = vmul.f32 %v1442_v37, %v1101_v40 }
 0xa0b   :  { %v1106_v41 = vsel %vm1105_vm7, %v1442_v37, %v1102_v7 }
 0xa0c   :  { %v1107_v43 = vmul.f32 %v1106_v41, %v1083_v10 }
 0xa0e   :  { %v1108_v45 = vmul.f32 %v1107_v43, %v1063_v42 }
 0xa10   :  { %v1109_v35 = vadd.f32 %v1108_v45, %v1064_v44 }
 0xa12   :  { %v1110_v46 = vadd.f32 %v1109_v35, %v1846_v22 }
 0xa14   :  { %v1111_v47 = vmax.f32 %v1110_v46, 0.0 }
 0xa16   :  { %1112 = vst [vmem:[#allocation19] sm:$0xff] %v1111_v47 }
 0xa70   :  { %v1127_v48 = vpop.xlane.xlu2 %1126 }
 0xa71   :  { %v1128_v49 = vrot.slane %v1127_v48, 4 }
 0xa73   :  { %v1129_v51 = vadd.f32 %v1128_v49, %v1127_v48 }
 0xa75   :  { %v1130_v52 = vrot.slane %v1129_v51, 2 }
 0xa77   :  { %v1131_v53 = vadd.f32 %v1130_v52, %v1129_v51 }
 0xa79   :  { %v1132_v54 = vrot.slane %v1131_v53, 1 }
 0xa7b   :  { %v1133_v55 = vadd.f32 %v1132_v54, %v1131_v53 }
 0xa7d   :  { %1368 = vpush %v1133_v55 }
 0xaae   :  { %s1369_s0 = spop %1368 }
 0xaaf   :  { %v1135_v56 = vstv %s1369_s0 }
 0xab0   :  { %v1136_v57 = vmul.f32 %v1135_v56, %v1081_v6 }
 0xab2   :  { %v1137_v50 = vadd.f32 1e-05, %v1136_v57 }
 0xab4   :  { %1443 = vrsqrt.f32 %v1137_v50  ;;  %vm1144_vm9 = vweird.f32 %v1137_v50 }
 0xaba   :  { %v1444_v58 = vpop.eup %1443 }
 0xabb   :  { %v1139_v59 = vmul.f32 %v1444_v58, %v1137_v50  ;;  %vm1145_vm8 = vweird.f32 %v1444_v58 }
 0xabc   :  { %vm1146_vm10 = vmor %vm1144_vm9, %vm1145_vm8 }
 0xabd   :  { %v1140_v60 = vmul.f32 %v1444_v58, %v1139_v59 }
 0xabf   :  { %v1141_v61 = vmul.f32 0.5, %v1140_v60 }
 0xac1   :  { %v1142_v22 = vsub.f32 1.5, %v1141_v61 }
 0xac3   :  { %v1143_v62 = vmul.f32 %v1444_v58, %v1142_v22 }
 0xac5   :  { %v1147_v63 = vsel %vm1146_vm10, %v1444_v58, %v1143_v62 }
 0xac6   :  { %v1148_v0 = vmul.f32 %v1147_v63, %v1124_v33 }
 0xac8   :  { %v1149_v1 = vmul.f32 %v1148_v0, %v1063_v42 }
 0xaca   :  { %v1150_v2 = vadd.f32 %v1149_v1, %v1064_v44 }
 0xacc   :  { %v1151_v3 = vadd.f32 %v1150_v2, %v1848_v23 }
 0xace   :  { %v1152_v4 = vmax.f32 %v1151_v3, 0.0 }
 0xad0   :  { %1153 = vst [vmem:[#allocation19 + $0x8] sm:$0xff] %v1152_v4 }
 0xad1   :  { %1166 = dma.vmem_to_hbm [thread:$0]  %s1159_s1, 256, %s1161_s3, [#allocation4], %s1730_s24, %s1730_s24, %s1731_s27  }
 0xad2   :  { %1721 = dma.done.wait [#allocation4], 256  }
 0xad3   :  { %1722 = vsyncadd [#allocation4], 4294967040 }
 0xad4   :  { %1171 = vsyncpa [#allocation3], 1 }
 0xad5   :  { %1172 = vsyncpa [#allocation6], 1 }
 0xad6   :  { %1173 = vsyncpa [#allocation9], 1 }
 0xad7   :  { %1174 = vsyncpa [#allocation12], 1 }
 0xad8   :  { %1175 = vsyncpa [#allocation15], 1 }
 0xad9   :  { %1176 = vsyncpa [#allocation18], 1 }
 0xada   :  { %1177 = vsyncpa [#allocation4], 1 }

</bundles_post_ra>
